<compile_context>
chip_gen: v7x
topology: tpu7x:2x2x1
jax: 0.10.0
libtpu: 0.0.40
codegen_flags: <defaults>
</compile_context>

<pallas_src>
import functools

import numpy as np

import jax
import jax.numpy as jnp
from jax.experimental import pallas as pl
from jax.experimental.pallas import tpu as pltpu

DEPTH = 3            # kernel is specialized to the module defaults (depth=3, layer=50)
LAYER = 50
LAYER_PAD = 64       # hidden width padded to a sublane-friendly size
CONST_ROW = LAYER    # zero-padding row repurposed to carry the folded biases
_SIGMOID_1 = 0.7310585786300049  # sigmoid(1) == silu(1), float64

assert LAYER < LAYER_PAD and LAYER_PAD % 8 == 0


def _silu(x):
    # silu(x) = x * sigmoid(x),  sigmoid(x) = 0.5 * (1 + tanh(x/2)).
    # One EUP transcendental per element (vs exp + reciprocal), exact, and
    # saturating (no exp overflow for very negative inputs).
    return x * (0.5 + 0.5 * jnp.tanh(0.5 * x))


def sinnet_kernel(x_ref, w1_ref, w2_ref, w3_ref, o_ref, *, matmul_dtype):
    md = matmul_dtype
    xa = x_ref[...].astype(md)                                    # [2, tb]: rows (x, 1)

    # Layer 1 (Linear(1, L)) on the MXU as a K=2 matmul; b1 is folded via the
    # ones row of xa, and CONST_ROW of w1 yields a pre-activation of exactly 1
    # -> h[CONST_ROW] == silu(1), used to fold b2/b3 downstream.
    h = _silu(jnp.dot(w1_ref[...], xa,
                      preferred_element_type=jnp.float32))        # [L_pad, tb]

    # Layer 2 (Linear(L, L)) on the MXU; b2 folded into the CONST column
    # (pre-scaled by 1/silu(1)); the CONST row regenerates the constant.
    h = _silu(jnp.dot(w2_ref[...], h.astype(md),
                      preferred_element_type=jnp.float32))        # [L_pad, tb]

    # Layer 3 (Linear(L, 1)) on the MXU with M padded to 8; b3 folded via the
    # CONST column.  Only row 0 is meaningful; store a lane-dense [1, tb] row.
    y = jnp.dot(w3_ref[...], h.astype(md),
                preferred_element_type=jnp.float32)               # [8, tb]
    o_ref[...] = y[0:1, :].astype(o_ref.dtype)


def pack_params(p, layer=LAYER, layer_pad=LAYER_PAD):
    """Fold every bias into zero-padded, MXU-friendly weight matrices.

    p: raw PyTorch-layout params (w1 [L,1], b1 [L], w2 [L,L], b2 [L],
    w3 [1,L], b3 [1]).  Padding rows/cols are zero (silu(0)=0 so they
    contribute nothing); row CONST_ROW carries a constant used to fold b2/b3.
    """
    c = _SIGMOID_1
    cr = CONST_ROW

    w1b = jnp.zeros((layer_pad, 2), jnp.float32)
    w1b = w1b.at[:layer, 0].set(p["w1"][:, 0].astype(jnp.float32))
    w1b = w1b.at[:layer, 1].set(p["b1"].astype(jnp.float32))
    w1b = w1b.at[cr, 1].set(1.0)                 # pre-activation 1 on the const row

    w2b = jnp.zeros((layer_pad, layer_pad), jnp.float32)
    w2b = w2b.at[:layer, :layer].set(p["w2"].astype(jnp.float32))
    w2b = w2b.at[:layer, cr].set(p["b2"].astype(jnp.float32) / c)   # b2 fold
    w2b = w2b.at[cr, cr].set(1.0 / c)            # regenerate the constant for layer 3

    w3b = jnp.zeros((8, layer_pad), jnp.float32)  # M padded to 8; only row 0 used
    w3b = w3b.at[0, :layer].set(p["w3"][0, :].astype(jnp.float32))
    w3b = w3b.at[0, cr].set(p["b3"][0].astype(jnp.float32) / c)     # b3 fold

    return {"w1b": w1b, "w2b": w2b, "w3b": w3b}


def _pick_tb(n_lanes):
    """Batch-tile (lane) width: biggest tile that still leaves >= 2 grid steps."""
    if n_lanes < 256:
        return n_lanes            # single 128-lane tile: nothing to split
    cap = 8192
    try:
        # 128-MiB-VMEM chips (v5e/v6e): bigger tiles amortize the ~0.35us/step
        # pipeline overhead; v7x (64 MiB VMEM, 2 TCs) keeps the 8K cap.
        if int(getattr(pltpu.get_tpu_info(), "vmem_capacity_bytes", 0)) >= 96 * 2**20:
            cap = 16384
    except Exception:
        pass
    half = (n_lanes // 2) // 128 * 128   # >= 2 steps so a v7x megacore can shard
    return max(128, min(cap, half))


def sinnet_forward(x, params, *, tb=None, matmul_dtype=jnp.float32):
    """x: [N, 1] float32; params: raw PyTorch-layout SinNet parameters.

    matmul_dtype=jnp.bfloat16 casts only the MXU operands (f32 accumulation,
    f32 elementwise) - the recommended perf setting on v6e/v7x."""
    assert x.ndim == 2 and x.shape[1] == 1
    N = x.shape[0]

    n_lanes = 128 * pl.cdiv(max(N, 1), 128)
    if tb is None:
        tb = _pick_tb(n_lanes)
    assert tb > 0 and tb % 128 == 0
    n_pad = tb * pl.cdiv(n_lanes, tb)

    # Lane-dense input (batch on the 128-wide lane axis); single jnp.pad, no
    # zeros+scatter pass.  Row 1 is the ones row that folds b1 / seeds CONST_ROW.
    xr = jnp.pad(x[:, 0].astype(jnp.float32), (0, n_pad - N))
    x_aug = jnp.stack([xr, jnp.ones_like(xr)], axis=0)            # [2, n_pad]

    packed = pack_params(params)
    md = matmul_dtype
    w1b = packed["w1b"].astype(md)
    w2b = packed["w2b"].astype(md)
    w3b = packed["w3b"].astype(md)

    L = LAYER_PAD
    w_elems = 2 * L + L * L + 8 * L
    cost = pl.CostEstimate(
        flops=2 * n_pad * w_elems,
        transcendentals=2 * L * n_pad,
        bytes_accessed=4 * (2 * n_pad + n_pad) + np.dtype(md).itemsize * w_elems,
    )

    full = lambda a: pl.BlockSpec(a.shape, lambda i: (0, 0))
    out = pl.pallas_call(
        functools.partial(sinnet_kernel, matmul_dtype=md),
        out_shape=jax.ShapeDtypeStruct((1, n_pad), jnp.float32),
        grid_spec=pl.GridSpec(
            grid=(n_pad // tb,),
            in_specs=[
                pl.BlockSpec((2, tb), lambda i: (0, i)),          # lane-dense x tile
                full(w1b), full(w2b), full(w3b),                  # resident weights (~17 KB)
            ],
            out_specs=pl.BlockSpec((1, tb), lambda i: (0, i)),    # lane-dense output row
        ),
        compiler_params=pltpu.CompilerParams(
            dimension_semantics=("parallel",),
            vmem_limit_bytes=(64 if tb > 8192 else 32) * 1024 * 1024,
        ),
        cost_estimate=cost,
    )(x_aug, w1b, w2b, w3b)

    return out[0, :N].reshape(N, 1)


def init_params(key, layer=LAYER):
    """PyTorch nn.Linear default init (uniform +-1/sqrt(fan_in)), raw layout."""
    ks = jax.random.split(key, 6)

    def unif(kk, shape, fan_in):
        b = 1.0 / float(fan_in) ** 0.5
        return jax.random.uniform(kk, shape, jnp.float32, -b, b)

    return {
        "w1": unif(ks[0], (layer, 1), 1),
        "b1": unif(ks[1], (layer,), 1),
        "w2": unif(ks[2], (layer, layer), layer),
        "b2": unif(ks[3], (layer,), layer),
        "w3": unif(ks[4], (1, layer), layer),
        "b3": unif(ks[5], (1,), layer),
    }


def sinnet_ref(x, p):
    """float64 NumPy reference (independent of XLA/MXU matmul precision)."""
    xd = np.asarray(x, np.float64)
    w1 = np.asarray(p["w1"], np.float64)
    b1 = np.asarray(p["b1"], np.float64)
    w2 = np.asarray(p["w2"], np.float64)
    b2 = np.asarray(p["b2"], np.float64)
    w3 = np.asarray(p["w3"], np.float64)
    b3 = np.asarray(p["b3"], np.float64)
    silu = lambda v: v / (1.0 + np.exp(-v))
    h = silu(xd @ w1.T + b1)
    h = silu(h @ w2.T + b2)
    return h @ w3.T + b3


if __name__ == "__main__":
    key = jax.random.PRNGKey(0)
    kp, kx = jax.random.split(key)
    params = init_params(kp)

    N = 256
    x = jax.random.uniform(kx, (N, 1), jnp.float32, -jnp.pi, jnp.pi)
    ref = sinnet_ref(x, params)

    # f32 path: typically matches the float64 reference to ~1e-6; the margin
    # absorbs generation-dependent MXU default-precision behaviour and the
    # tanh-form sigmoid.
    out = jax.block_until_ready(sinnet_forward(x, params))
    assert out.shape == (N, 1)
    err = float(np.max(np.abs(np.asarray(out, np.float64) - ref)))
    assert err < 5e-3, f"f32 path max abs err {err}"

    # bf16 MXU operands (perf default on v6e/v7x): looser tolerance.
    out_bf16 = jax.block_until_ready(
        sinnet_forward(x, params, matmul_dtype=jnp.bfloat16))
    err_bf16 = float(np.max(np.abs(np.asarray(out_bf16, np.float64) - ref)))
    assert err_bf16 < 3e-2, f"bf16 path max abs err {err_bf16}"

    # Ragged batch: exercises lane padding / tail slicing in the wrapper.
    N2 = 100
    x2 = jax.random.uniform(jax.random.PRNGKey(7), (N2, 1), jnp.float32,
                            -jnp.pi, jnp.pi)
    out2 = jax.block_until_ready(sinnet_forward(x2, params))
    assert out2.shape == (N2, 1)
    err2 = float(np.max(np.abs(np.asarray(out2, np.float64) - sinnet_ref(x2, params))))
    assert err2 < 5e-3, f"ragged f32 path max abs err {err2}"

    print("KERNEL_OK")
</pallas_src>

<mosaic_0001>
module attributes {stable_mosaic.version = 11 : i64} {
  func.func @sinnet_kernel(%arg0: i32, %arg1: memref<2x128xf32, #tpu.memory_space<vmem>>, %arg2: memref<64x2xf32, #tpu.memory_space<vmem>>, %arg3: memref<64x64xf32, #tpu.memory_space<vmem>>, %arg4: memref<8x64xf32, #tpu.memory_space<vmem>>, %arg5: memref<1x128xf32, #tpu.memory_space<vmem>>) attributes {dimension_semantics = [#tpu.dimension_semantics<parallel>], iteration_bounds = array<i64: 2>, scalar_prefetch = 0 : i64, scratch_operands = 0 : i64, tpu.core_type = #tpu.core_type<tc>, window_params = [{transform_indices = @transform_0, window_bounds = array<i64: 2, 128>}, {pipeline_mode = #tpu.pipeline_mode<synchronous>, transform_indices = @transform_1, window_bounds = array<i64: 64, 2>}, {pipeline_mode = #tpu.pipeline_mode<synchronous>, transform_indices = @transform_2, window_bounds = array<i64: 64, 64>}, {pipeline_mode = #tpu.pipeline_mode<synchronous>, transform_indices = @transform_3, window_bounds = array<i64: 8, 64>}, {transform_indices = @transform_4, window_bounds = array<i64: 1, 128>}]} {
    %c0 = arith.constant 0 : index
    %c0_0 = arith.constant 0 : index
    %0 = vector.load %arg1[%c0, %c0_0] : memref<2x128xf32, #tpu.memory_space<vmem>>, vector<2x128xf32>
    %c0_1 = arith.constant 0 : index
    %c0_2 = arith.constant 0 : index
    %1 = vector.load %arg2[%c0_1, %c0_2] : memref<64x2xf32, #tpu.memory_space<vmem>>, vector<64x2xf32>
    %cst = arith.constant dense<0.000000e+00> : vector<64x128xf32>
    %2 = tpu.matmul %1, %0, %cst {dimension_numbers = #tpu.dot_dimension_numbers<[1], [0], [0], [1], [0, 0, 1, 1], [], []>} : vector<64x2xf32>, vector<2x128xf32>, vector<64x128xf32> -> vector<64x128xf32>
    %cst_3 = arith.constant 5.000000e-01 : f32
    %3 = vector.broadcast %cst_3 : f32 to vector<64x128xf32>
    %4 = arith.mulf %3, %2 : vector<64x128xf32>
    %5 = math.tanh %4 : vector<64x128xf32>
    %cst_4 = arith.constant 5.000000e-01 : f32
    %6 = vector.broadcast %cst_4 : f32 to vector<64x128xf32>
    %7 = arith.mulf %6, %5 : vector<64x128xf32>
    %cst_5 = arith.constant 5.000000e-01 : f32
    %8 = vector.broadcast %cst_5 : f32 to vector<64x128xf32>
    %9 = arith.addf %8, %7 : vector<64x128xf32>
    %10 = arith.mulf %2, %9 : vector<64x128xf32>
    %c0_6 = arith.constant 0 : index
    %c0_7 = arith.constant 0 : index
    %11 = vector.load %arg3[%c0_6, %c0_7] : memref<64x64xf32, #tpu.memory_space<vmem>>, vector<64x64xf32>
    %cst_8 = arith.constant dense<0.000000e+00> : vector<64x128xf32>
    %12 = tpu.matmul %11, %10, %cst_8 {dimension_numbers = #tpu.dot_dimension_numbers<[1], [0], [0], [1], [0, 0, 1, 1], [], []>} : vector<64x64xf32>, vector<64x128xf32>, vector<64x128xf32> -> vector<64x128xf32>
    %cst_9 = arith.constant 5.000000e-01 : f32
    %13 = vector.broadcast %cst_9 : f32 to vector<64x128xf32>
    %14 = arith.mulf %13, %12 : vector<64x128xf32>
    %15 = math.tanh %14 : vector<64x128xf32>
    %cst_10 = arith.constant 5.000000e-01 : f32
    %16 = vector.broadcast %cst_10 : f32 to vector<64x128xf32>
    %17 = arith.mulf %16, %15 : vector<64x128xf32>
    %cst_11 = arith.constant 5.000000e-01 : f32
    %18 = vector.broadcast %cst_11 : f32 to vector<64x128xf32>
    %19 = arith.addf %18, %17 : vector<64x128xf32>
    %20 = arith.mulf %12, %19 : vector<64x128xf32>
    %c0_12 = arith.constant 0 : index
    %c0_13 = arith.constant 0 : index
    %21 = vector.load %arg4[%c0_12, %c0_13] : memref<8x64xf32, #tpu.memory_space<vmem>>, vector<8x64xf32>
    %cst_14 = arith.constant dense<0.000000e+00> : vector<8x128xf32>
    %22 = tpu.matmul %21, %20, %cst_14 {dimension_numbers = #tpu.dot_dimension_numbers<[1], [0], [0], [1], [0, 0, 1, 1], [], []>} : vector<8x64xf32>, vector<64x128xf32>, vector<8x128xf32> -> vector<8x128xf32>
    %23 = vector.extract_strided_slice %22 {offsets = [0, 0], sizes = [1, 128], strides = [1, 1]} : vector<8x128xf32> to vector<1x128xf32>
    %c0_15 = arith.constant 0 : index
    %c0_16 = arith.constant 0 : index
    %24 = vector.load %arg5[%c0_15, %c0_16] : memref<1x128xf32, #tpu.memory_space<vmem>>, vector<1x128xf32>
    tpu.vector_store %arg5[%c0_15, %c0_16], %23 {strides = array<i32>} : memref<1x128xf32, #tpu.memory_space<vmem>>, vector<1x128xf32>,
    return
  }
  func.func @transform_0(%arg0: i32) -> (i32, i32) {
    %c0_i32 = arith.constant 0 : i32
    %c0_i32_0 = arith.constant 0 : i32
    return %c0_i32, %arg0 : i32, i32
  }
  func.func @transform_1(%arg0: i32) -> (i32, i32) {
    %c0_i32 = arith.constant 0 : i32
    %c0_i32_0 = arith.constant 0 : i32
    %c0_i32_1 = arith.constant 0 : i32
    return %c0_i32, %c0_i32_0 : i32, i32
  }
  func.func @transform_2(%arg0: i32) -> (i32, i32) {
    %c0_i32 = arith.constant 0 : i32
    %c0_i32_0 = arith.constant 0 : i32
    %c0_i32_1 = arith.constant 0 : i32
    return %c0_i32, %c0_i32_0 : i32, i32
  }
  func.func @transform_3(%arg0: i32) -> (i32, i32) {
    %c0_i32 = arith.constant 0 : i32
    %c0_i32_0 = arith.constant 0 : i32
    %c0_i32_1 = arith.constant 0 : i32
    return %c0_i32, %c0_i32_0 : i32, i32
  }
  func.func @transform_4(%arg0: i32) -> (i32, i32) {
    %c0_i32 = arith.constant 0 : i32
    %c0_i32_0 = arith.constant 0 : i32
    return %c0_i32, %arg0 : i32, i32
  }
}

</mosaic_0001>

<bundles_post_ra>
// kernel: tpu_custom_call.1
= control target key start
LH: loop header
LB: loop body
LE: loop exit
PB: predicated region body
PF: predicated region fallthrough
CT: control target
= control target key end

     0   :  { %9 = vsyncpa [#allocation3], 0  ;;  %s1321_s0 = inlined_call_operand.hbm [shape: f32[2,256], index: 0, kind: input, shape index: {}]   ;;  %s1322_s1 = inlined_call_operand.vmem [shape: f32[64,2], index: 1, kind: input, shape index: {}]   ;;  %s1323_s2 = inlined_call_operand.vmem [shape: f32[64,64], index: 2, kind: input, shape index: {}]   ;;  %s1324_s3 = inlined_call_operand.vmem [shape: f32[8,64], index: 3, kind: input, shape index: {}]   ;;  %s1325_s4 = inlined_call_operand.hbm [shape: f32[1,256], index: 4, kind: output, shape index: {}]  }
   0x1   :  { %11 = vsyncpa [#allocation3 + $0x1], 0 }
   0x2   :  { %12 = vsyncpa [#allocation4], 0 }
   0x3   :  { %14 = vsyncpa [#allocation4 + $0x1], 0  ;;  %s1087_s15 = smov 0   ;;  %s1089_s16 = smov 0  }
   0x4   :  { %s1091_s17 = smov 0   ;;  %s1093_s18 = smov 0  }
   0x5 LB: > { %s1108_s19 = sadd.s32 4294967295, %s1055_s18   ;;  %s727_s20 = sadd.s32 4294967294, %s1055_s18   ;;  %s1055_s18 = sphi %s1093_s18, %s1340_s18   ;;  %s1051_s17 = sphi %s1091_s17, %s1339_s17   ;;  %s1047_s16 = sphi %s1089_s16, %s1338_s16   ;;  %s1043_s15 = sphi %s1087_s15, %s1337_s15  }
   0x6   : > { %s1112_s21 = sadd.s32 1, %s1055_s18   ;;  %s27_s22 = sadd.s32 1, %s1051_s17 }
   0x7   : > { %s24_s23 = ssub.s32 %s1055_s18, %s1112_s21  ;;  %p34_p0 = scmp.ne.s32.totalorder %s1051_s17, %s1047_s16 }
   0x8   : > { %p25_p1 = scmp.eq.s32.totalorder %s24_s23, 0  ;;  %p35_p2 = scmp.eq.s32.totalorder %s1055_s18, 0 }
   0x9   : > { %p40_p3 = scmp.ne.s32.totalorder %s1047_s16, %s1043_s15  ;;  %p41_p4 = scmp.eq.s32.totalorder %s1108_s19, 0 }
   0xa   : > { %s1124_s24 = scalar_select %p25_p1, %s1051_s17, %s27_s22  }
   0xb   : > { %p1126_p5 = por %p35_p2, %p34_p0  ;;  %p1130_p6 = por %p41_p4, %p40_p3 }
   0xc   : > { %p127_p7 = scmp.eq.s32.totalorder %s1108_s19, 1  ;;  %p133_p8 = scmp.eq.s32.totalorder %s727_s20, 1 }
   0xd   : > { %p890_p10 = scmp.lt.s32.totalorder %s1055_s18, 2  ;;  %s162_s29 = sand.u32 1, %s1051_s17  }
   0xe   : > { %p1137_p11 = por %p127_p7, %p34_p0  ;;  %p1141_p12 = por %p133_p8, %p40_p3 }
   0xf   : > { %s731_s30 = sshll.u32 %s1055_s18, 5  ;;  %s730_s5 = sshll.u32 %s162_s29, 1 }
  0x10   : > { %s1329_s27 = scalar_select %p1137_p11, 1, 0 }
  0x11   : > { %s1330_s28 = scalar_select %p1141_p12, 1, 0 }
  0x12   : > { %s1150_s8 = scalar_lea.hbm %s1321_s0, %s731_s30  ;;  %s166_s9 = scalar_lea.vmem [#allocation2], %s730_s5 }
  0x13   : > { %s173_s10 = sshll.u32 %s166_s9, 4  ;;  %p1154_p13 = pnand %p890_p10, %p1126_p5  ;;  %s1158_s10 = int_to_ptr.vmem [resolvable:$true] %s173_s10 }
  0x14   : > { %s163_s12 = scalar_lea.sflag [#allocation3], %s162_s29  ;;  %s959_s13 = scalar_lea.hbm %s1150_s8, 32 }
  0x15   : > { %p960_p2 = scmp.ne.s32.totalorder %s1150_s8, %s959_s13  ;;  %p961_p3 = pneg %p1154_p13 }
  0x16   : > { %s964_s22 = scalar_lea.hbm %s1321_s0, 64  ;;  %p965_p5 = scmp.lt.u32.totalorder %s1150_s8, %s1321_s0 }
  0x17   : > { %p962_p4 = pnand %p961_p3, %p960_p2  ;;  %p966_p8 = scmp.lt.u32.totalorder %s964_s22, %s959_s13 }
  0x18   : > { %p968_p9 = scmp.lt.u32.totalorder %s959_s13, %s1150_s8 }
  0x19   : > { %p963_p7 = pneg %p962_p4  ;;  %p967_p10 = por %p966_p8, %p965_p5 }
  0x1b   : > { %p969_p0 = por %p968_p9, %p967_p10 }
  0x1d   : > { %p970_p1 = pnand %p969_p0, %p963_p7 }
  0x1f   : > { %973 = shalt.err (!%p970_p1)
}
  0x20   : > { %s974_s29 = scalar_lea.vmem %s1158_s10, 32  ;;  %s1057_s30 = smov [#allocation2]  }
  0x21   : > { %p975_p2 = scmp.ne.s32.totalorder %s1158_s10, %s974_s29  ;;  %s979_s5 = sshll.u32 %s1057_s30, 4  ;;  %s980_s5 = int_to_ptr.vmem [resolvable:$false] %s979_s5 }
  0x22   : > { %s981_s6 = scalar_lea.vmem %s980_s5, 64  ;;  %p982_p11 = scmp.lt.s32.totalorder %s1158_s10, %s980_s5 }
  0x23   : > { %p977_p4 = pnand %p975_p2, %p961_p3  ;;  %p983_p5 = scmp.lt.s32.totalorder %s981_s6, %s974_s29 }
  0x25   : > { %p978_p12 = pneg %p977_p4  ;;  %p984_p8 = por %p983_p5, %p982_p11 }
  0x27   : > { %p985_p9 = pnand %p984_p8, %p978_p12 }
  0x29   : > { %988 = shalt.err (!%p985_p9)
}
  0x2a   : > { %885 = dma.hbm_to_vmem [thread:$0]  (!%p1154_p13), %s1150_s8, 32, %s1158_s10, %s163_s12  }
  0x2b   : > { %p1332_p0 = scmp.lt.s32.totalorder %s1055_s18, 3  ;;  %p1333_p1 = scmp.ge.s32.totalorder %s1055_s18, 1 }
  0x2d   : > { %p179_p3 = pnand %p1333_p1, %p1332_p0 }
  0x2e   : > { %s1192_s7 = sand.u32 (!%p179_p3), 1, %s1047_s16  }
  0x2f   : > { %182 = sbr.rel (%p179_p3) target bundleno = 783 (0x30f), region = 36  ;;  %s733_s9 = sshll.u32 (!%p179_p3), %s1192_s7, 1 }
  0x30   : > { %s185_s13 = scalar_lea.sflag (!%p179_p3), [#allocation3], %s1192_s7  ;;  %s188_s14 = scalar_lea.vmem (!%p179_p3), [#allocation2], %s733_s9 }
  0x36   : > { %1034 = dma.done.wait (%p1130_p6), %s185_s13, 32  }
  0x37   : > { %1036 = vsyncadd (%p1130_p6), %s185_s13, 4294967264  ;;  %vm246_vm0 = vcmask 1041408   ;;  %vm221_vm1 = vcmask 15360   ;;  %v212_v0 = vld [vmem:[%s188_s14] sm:$0x3]  ;;  %v214_v2 = vld [vmem:[%s1322_s1 + $0x8] sm:$0xff] }
  0x38   : > { %v213_v1 = vld [vmem:[%s1322_s1] sm:$0xff]  ;;  %789 = vmatprep.subr.msk.mxu0 %vm246_vm0, %v212_v0  ;;  %v215_v3 = vld [vmem:[%s1322_s1 + $0x10] sm:$0xff]  ;;  %v216_v4 = vld [vmem:[%s1322_s1 + $0x18] sm:$0xff]  ;;  %vm403_vm2 = vcmask 523264   ;;  %vm1059_vm3 = vmmov 0   ;;  %s211_s11 = scalar_lea.vmem [#allocation5], %s1192_s7 }
  0x39   : > { %791 = vmatprep.mubr.msk.f32.mxu0 %vm221_vm1, %v213_v1  ;;  %790 = vmatpush3.msk.msra.mxu0 %vm246_vm0, %v212_v0  ;;  %v217_v5 = vld [vmem:[%s1322_s1 + $0x20] sm:$0xff]  ;;  %v218_v6 = vld [vmem:[%s1322_s1 + $0x28] sm:$0xff]  ;;  %v219_v7 = vld [vmem:[%s1322_s1 + $0x30] sm:$0xff]  ;;  %s661_s12 = sshll.u32 %s211_s11, 4  ;;  %s752_s20 = sshll.u32 %s1108_s19, 4  ;;  %s1274_s12 = int_to_ptr.vmem [resolvable:$true] %s661_s12 }
  0x3a   : > { %792 = vmatmul.mubr.msk.f32.vlgmr.msra.gmra.mrb[0].mxu0 %vm221_vm1, %v214_v2  ;;  %v220_v8 = vld [vmem:[%s1322_s1 + $0x38] sm:$0xff]  ;;  %v395_v9 = vld [vmem:[%s1323_s2] sm:$0xff]  ;;  %v396_v62 = vld [vmem:[%s1323_s2 + $0x8] sm:$0xff]  ;;  %s1279_s23 = scalar_lea.hbm %s1325_s4, %s752_s20  ;;  %s649_s25 = scalar_lea.sflag [#allocation4], %s1192_s7 }
  0x3b   : > { %794 = vmatprep.mubr.msk.f32.mxu0 %vm221_vm1, %v215_v3  ;;  %819 = vmatprep.mubr.msk.f32.mxu1 %vm403_vm2, %v395_v9  ;;  %v397_v63 = vld [vmem:[%s1323_s2 + $0x10] sm:$0xff]  ;;  %v398_v0 = vld [vmem:[%s1323_s2 + $0x18] sm:$0xff]  ;;  %v399_v1 = vld [vmem:[%s1323_s2 + $0x20] sm:$0xff]  ;;  %s989_s29 = scalar_lea.vmem %s1274_s12, 16  ;;  %p1334_p11 = scmp.ne.s32.totalorder %s1329_s27, 0 }
  0x3c   : > { %v400_v2 = vld [vmem:[%s1323_s2 + $0x28] sm:$0xff]  ;;  %v401_v3 = vld [vmem:[%s1323_s2 + $0x30] sm:$0xff]  ;;  %p990_p6 = scmp.ne.s32.totalorder %s1274_s12, %s989_s29  ;;  %s1061_s19 = smov [#allocation5]  }
  0x3d   : > { %s993_s30 = sshll.u32 %s1061_s19, 4  ;;  %s994_s30 = int_to_ptr.vmem [resolvable:$false] %s993_s30 }
  0x3e   : > { %795 = vmatmul.mubr.msk.f32.gmra.mrb[2].mxu0 %vm221_vm1, %v216_v4  ;;  %v402_v4 = vld [vmem:[%s1323_s2 + $0x38] sm:$0xff]  ;;  %p991_p12 = pnand %p990_p6, %p1334_p11  ;;  %s995_s5 = scalar_lea.vmem %s994_s30, 32 }
  0x3f   : > { %797 = vmatprep.mubr.msk.f32.mxu0 %vm221_vm1, %v217_v5  ;;  %v1058_v5 = vmov 0.0|0.0   ;;  %p996_p7 = scmp.lt.s32.totalorder %s1274_s12, %s994_s30  ;;  %p997_p10 = scmp.lt.s32.totalorder %s995_s5, %s989_s29 }
  0x40   : > { %866 = vmatprep.subr.bf16.mxu0 %v1058_v5  ;;  %p992_p13 = pneg %p991_p12 }
  0x41   : > { %p998_p2 = por %p997_p10, %p996_p7 }
  0x42   : > { %798 = vmatmul.mubr.msk.f32.gmra.mrb[4].mxu0 %vm221_vm1, %v218_v6  ;;  %v1060_v6 = vmov 0.0  }
  0x43   : > { %800 = vmatprep.mubr.msk.f32.mxu0 %vm221_vm1, %v219_v7  ;;  %p999_p4 = pnand %p998_p2, %p992_p13 }
  0x46   : > { %801 = vmatmul.mubr.msk.f32.gmra.mrb[6].mxu0 %vm221_vm1, %v220_v8 }
  0x47   : > { %847 = vmatprep.mubr.msk.f32.mxu0 %vm1059_vm3, %v1060_v6 }
 0x10d   : > { %v793_v10 = vpop.f32.mrb[0].mxu0 }
 0x10e   : > { %v356_v11 = vmul.f32 0.5, %v793_v10  ;;  %v316_v12 = vpop.f32.mrb[1].mxu0 }
 0x10f   : > { %v355_v13 = vmul.f32 0.5, %v316_v12 }
 0x110   : > { %927 = vtanh.f32 %v356_v11 }
 0x111   : > { %929 = vtanh.f32 %v355_v13  ;;  %v796_v14 = vpop.f32.mrb[2].mxu0 }
 0x112   : > { %v358_v15 = vmul.f32 0.5, %v796_v14  ;;  %v326_v16 = vpop.f32.mrb[3].mxu0 }
 0x113   : > { %v357_v17 = vmul.f32 0.5, %v326_v16 }
 0x114   : > { %931 = vtanh.f32 %v358_v15 }
 0x115   : > { %933 = vtanh.f32 %v357_v17  ;;  %v799_v18 = vpop.f32.mrb[4].mxu0 }
 0x116   : > { %v360_v19 = vmul.f32 0.5, %v799_v18  ;;  %v336_v20 = vpop.f32.mrb[5].mxu0 }
 0x117   : > { %v359_v21 = vmul.f32 0.5, %v336_v20 }
 0x118   : > { %935 = vtanh.f32 %v360_v19 }
 0x119   : > { %937 = vtanh.f32 %v359_v21  ;;  %v802_v22 = vpop.f32.mrb[6].mxu0 }
 0x11a   : > { %v928_v23 = vpop.eup %927  ;;  %v362_v24 = vmul.f32 0.5, %v802_v22  ;;  %v346_v25 = vpop.f32.mrb[7].mxu0 }
 0x11b   : > { %v930_v26 = vpop.eup %929  ;;  %v372_v27 = vmul.f32 0.5, %v928_v23  ;;  %v361_v28 = vmul.f32 0.5, %v346_v25 }
 0x11c   : > { %v371_v29 = vmul.f32 0.5, %v930_v26  ;;  %939 = vtanh.f32 %v362_v24 }
 0x11d   : > { %v380_v30 = vadd.f32 0.5, %v372_v27  ;;  %941 = vtanh.f32 %v361_v28 }
 0x11e   : > { %v932_v31 = vpop.eup %931  ;;  %v379_v32 = vadd.f32 0.5, %v371_v29 }
 0x11f   : > { %v934_v33 = vpop.eup %933  ;;  %v388_v34 = vmul.f32 %v793_v10, %v380_v30  ;;  %v374_v35 = vmul.f32 0.5, %v932_v31 }
 0x120   : > { %v387_v36 = vmul.f32 %v379_v32, %v316_v12  ;;  %v373_v37 = vmul.f32 0.5, %v934_v33 }
 0x121   : > { %v382_v38 = vadd.f32 0.5, %v374_v35 }
 0x122   : > { %v936_v39 = vpop.eup %935  ;;  %v381_v40 = vadd.f32 0.5, %v373_v37  ;;  %v850_v41 = vpack.c.bf16 %v388_v34, %v387_v36 }
 0x123   : > { %v938_v42 = vpop.eup %937  ;;  %v390_v43 = vmul.f32 %v796_v14, %v382_v38  ;;  %v376_v44 = vmul.f32 0.5, %v936_v39 }
 0x124   : > { %v389_v45 = vmul.f32 %v381_v40, %v326_v16  ;;  %v375_v46 = vmul.f32 0.5, %v938_v42  ;;  %851 = vmatprep.subr.bf16.mxu1 %v850_v41 }
 0x125   : > { %v384_v47 = vadd.f32 0.5, %v376_v44  ;;  %853 = vmatpush3.bf16.msra.mxu1 %v850_v41 }
 0x126   : > { %v940_v48 = vpop.eup %939  ;;  %v854_v49 = vpack.c.bf16 %v390_v43, %v389_v45  ;;  %v383_v50 = vadd.f32 0.5, %v375_v46 }
 0x127   : > { %v942_v51 = vpop.eup %941  ;;  %v392_v52 = vmul.f32 %v799_v18, %v384_v47  ;;  %v378_v53 = vmul.f32 0.5, %v940_v48 }
 0x128   : > { %v391_v54 = vmul.f32 %v383_v50, %v336_v20  ;;  %v377_v55 = vmul.f32 0.5, %v942_v51  ;;  %855 = vmatprep.subr.bf16.mxu1 %v854_v49 }
 0x129   : > { %v386_v56 = vadd.f32 0.5, %v378_v53  ;;  %857 = vmatpush3.bf16.msra.mxu1 %v854_v49 }
 0x12a   : > { %v858_v57 = vpack.c.bf16 %v392_v52, %v391_v54  ;;  %v385_v58 = vadd.f32 0.5, %v377_v55 }
 0x12b   : > { %v394_v59 = vmul.f32 %v802_v22, %v386_v56 }
 0x12c   : > { %v393_v60 = vmul.f32 %v385_v58, %v346_v25  ;;  %859 = vmatprep.subr.bf16.mxu1 %v858_v57 }
 0x12d   : > { %861 = vmatpush3.bf16.msra.mxu1 %v858_v57 }
 0x12e   : > { %v862_v61 = vpack.c.bf16 %v394_v59, %v393_v60  ;;  %v573_v59 = vld [vmem:[%s1324_s3] sm:$0xff] }
 0x130   : > { %863 = vmatprep.subr.bf16.mxu1 %v862_v61 }
 0x131   : > { %865 = vmatpush3.bf16.msra.mxu1 %v862_v61 }
 0x134   : > { %820 = vmatmul.mubr.msk.f32.vlgmr.msra.gmra.mrb[0].mxu1 %vm403_vm2, %v396_v62 }
 0x135   : > { %822 = vmatprep.mubr.msk.f32.mxu1 %vm403_vm2, %v397_v63 }
 0x138   : > { %823 = vmatmul.mubr.msk.f32.gmra.mrb[2].mxu1 %vm403_vm2, %v398_v0 }
 0x139   : > { %825 = vmatprep.mubr.msk.f32.mxu1 %vm403_vm2, %v399_v1 }
 0x13c   : > { %826 = vmatmul.mubr.msk.f32.gmra.mrb[4].mxu1 %vm403_vm2, %v400_v2 }
 0x13d   : > { %828 = vmatprep.mubr.msk.f32.mxu1 %vm403_vm2, %v401_v3 }
 0x140   : > { %829 = vmatmul.mubr.msk.f32.gmra.mrb[6].mxu1 %vm403_vm2, %v402_v4 }
 0x207   : > { %v821_v7 = vpop.f32.mrb[0].mxu1 }
 0x208   : > { %v534_v8 = vmul.f32 0.5, %v821_v7  ;;  %v494_v9 = vpop.f32.mrb[1].mxu1 }
 0x209   : > { %v533_v10 = vmul.f32 0.5, %v494_v9 }
 0x20a   : > { %943 = vtanh.f32 %v534_v8 }
 0x20b   : > { %945 = vtanh.f32 %v533_v10  ;;  %v824_v11 = vpop.f32.mrb[2].mxu1 }
 0x20c   : > { %v536_v12 = vmul.f32 0.5, %v824_v11  ;;  %v504_v13 = vpop.f32.mrb[3].mxu1 }
 0x20d   : > { %v535_v14 = vmul.f32 0.5, %v504_v13 }
 0x20e   : > { %947 = vtanh.f32 %v536_v12 }
 0x20f   : > { %949 = vtanh.f32 %v535_v14  ;;  %v827_v15 = vpop.f32.mrb[4].mxu1 }
 0x210   : > { %v538_v16 = vmul.f32 0.5, %v827_v15  ;;  %v514_v17 = vpop.f32.mrb[5].mxu1 }
 0x211   : > { %v537_v18 = vmul.f32 0.5, %v514_v17 }
 0x212   : > { %951 = vtanh.f32 %v538_v16 }
 0x213   : > { %953 = vtanh.f32 %v537_v18  ;;  %v830_v19 = vpop.f32.mrb[6].mxu1 }
 0x214   : > { %v944_v20 = vpop.eup %943  ;;  %v540_v21 = vmul.f32 0.5, %v830_v19  ;;  %v524_v22 = vpop.f32.mrb[7].mxu1 }
 0x215   : > { %v946_v23 = vpop.eup %945  ;;  %v550_v24 = vmul.f32 0.5, %v944_v20  ;;  %v539_v25 = vmul.f32 0.5, %v524_v22 }
 0x216   : > { %v549_v26 = vmul.f32 0.5, %v946_v23  ;;  %955 = vtanh.f32 %v540_v21 }
 0x217   : > { %v558_v27 = vadd.f32 0.5, %v550_v24  ;;  %957 = vtanh.f32 %v539_v25 }
 0x218   : > { %v948_v28 = vpop.eup %947  ;;  %v557_v29 = vadd.f32 0.5, %v549_v26 }
 0x219   : > { %v950_v30 = vpop.eup %949  ;;  %v566_v31 = vmul.f32 %v821_v7, %v558_v27  ;;  %v552_v32 = vmul.f32 0.5, %v948_v28 }
 0x21a   : > { %v565_v33 = vmul.f32 %v557_v29, %v494_v9  ;;  %v551_v34 = vmul.f32 0.5, %v950_v30 }
 0x21b   : > { %v560_v35 = vadd.f32 0.5, %v552_v32 }
 0x21c   : > { %v952_v36 = vpop.eup %951  ;;  %v867_v37 = vpack.c.bf16 %v566_v31, %v565_v33  ;;  %v559_v38 = vadd.f32 0.5, %v551_v34 }
 0x21d   : > { %v954_v39 = vpop.eup %953  ;;  %v568_v40 = vmul.f32 %v824_v11, %v560_v35  ;;  %v554_v41 = vmul.f32 0.5, %v952_v36 }
 0x21e   : > { %v567_v42 = vmul.f32 %v559_v38, %v504_v13  ;;  %v553_v43 = vmul.f32 0.5, %v954_v39  ;;  %868 = vmatpush3.bf16.msra.mxu0 %v867_v37 }
 0x21f   : > { %v562_v44 = vadd.f32 0.5, %v554_v41  ;;  %869 = vmatprep.subr.bf16.mxu0 %v1058_v5 }
 0x220   : > { %v956_v45 = vpop.eup %955  ;;  %v870_v46 = vpack.c.bf16 %v568_v40, %v567_v42  ;;  %v561_v47 = vadd.f32 0.5, %v553_v43 }
 0x221   : > { %v958_v48 = vpop.eup %957  ;;  %v570_v49 = vmul.f32 %v827_v15, %v562_v44  ;;  %v556_v50 = vmul.f32 0.5, %v956_v45 }
 0x222   : > { %v569_v51 = vmul.f32 %v561_v47, %v514_v17  ;;  %v555_v52 = vmul.f32 0.5, %v958_v48  ;;  %871 = vmatpush3.bf16.msra.mxu0 %v870_v46 }
 0x223   : > { %v564_v53 = vadd.f32 0.5, %v556_v50  ;;  %872 = vmatprep.subr.bf16.mxu0 %v1058_v5 }
 0x224   : > { %v873_v54 = vpack.c.bf16 %v570_v49, %v569_v51  ;;  %v563_v55 = vadd.f32 0.5, %v555_v52 }
 0x225   : > { %v572_v56 = vmul.f32 %v830_v19, %v564_v53 }
 0x226   : > { %v571_v57 = vmul.f32 %v563_v55, %v524_v22  ;;  %874 = vmatpush3.bf16.msra.mxu0 %v873_v54 }
 0x227   : > { %875 = vmatprep.subr.bf16.mxu0 %v1058_v5 }
 0x228   : > { %v876_v58 = vpack.c.bf16 %v572_v56, %v571_v57 }
 0x22a   : > { %877 = vmatpush3.bf16.msra.mxu0 %v876_v58 }
 0x22d   : > { %848 = vmatmul.mubr.msk.f32.vlgmr.msra.gmra.mrb[8].mxu0 %vm403_vm2, %v573_v59 }
 0x300   : > { %v643_v60 = vpop.f32.mrb[8].mxu0 }
 0x301   : > { %647 = vst [vmem:[%s211_s11] sm:$0x1] %v643_v60  ;;  %v849_v61 = vpop.f32.mrb[9].mxu0 }
 0x302   : > { %1002 = shalt.err (!%p999_p4)
}
 0x303   : > { %s1003_s7 = scalar_lea.hbm %s1279_s23, 16  ;;  %s1007_s13 = scalar_lea.hbm %s1325_s4, 32 }
 0x304   : > { %p1004_p5 = scmp.ne.s32.totalorder %s1279_s23, %s1003_s7  ;;  %p1008_p0 = scmp.lt.u32.totalorder %s1279_s23, %s1325_s4 }
 0x305   : > { %p1009_p1 = scmp.lt.u32.totalorder %s1007_s13, %s1003_s7  ;;  %p1011_p6 = scmp.lt.u32.totalorder %s1003_s7, %s1279_s23 }
 0x306   : > { %p1005_p8 = pnand %p1004_p5, %p1334_p11 }
 0x307   : > { %p1010_p3 = por %p1009_p1, %p1008_p0 }
 0x308   : > { %p1006_p9 = pneg %p1005_p8 }
 0x309   : > { %p1012_p12 = por %p1011_p6, %p1010_p3 }
 0x30b   : > { %p1013_p13 = pnand %p1012_p12, %p1006_p9 }
 0x30d   : > { %1016 = shalt.err (!%p1013_p13)
}
 0x30e   : > { %880 = dma.vmem_to_hbm [thread:$0]  (%p1334_p11), %s1274_s12, 16, %s1279_s23, %s649_s25  }
 0x30f PF: > { %s673_s10 = sand.u32 1, %s1043_s15   ;;  %p1335_p7 = scmp.ne.s32.totalorder %s1330_s28, 0 }
 0x310   : > { %p1336_p10 = scmp.ge.s32.totalorder %s1055_s18, 2  ;;  %s674_s11 = scalar_lea.sflag [#allocation4], %s673_s10 }
 0x312   : > { %p887_p2 = pnand %p1336_p10, %p1335_p7 }
 0x314   : > { %1038 = dma.done.wait (!%p887_p2), %s674_s11, 16  }
 0x315   : > { %1040 = vsyncadd (!%p887_p2), %s674_s11, 4294967280  ;;  %p17_p4 = scmp.ge.s32.totalorder %s1112_s21, 4   ;;  %s1337_s15 = smov %s1047_s16 }
 0x316   : > { %s1338_s16 = smov %s1051_s17  ;;  %s1339_s17 = smov %s1124_s24 }
 0x317   : > { %s1340_s18 = smov %s1112_s21  ;;  %19 = sbr.rel (!%p17_p4) target bundleno = 5 (0x5), region = 81 }
 0x31e   :  { %678 = vsyncpa [#allocation3], 1 }
 0x31f   :  { %680 = vsyncpa [#allocation3 + $0x1], 1 }
 0x320   :  { %681 = vsyncpa [#allocation4], 1 }
 0x321   :  { %683 = vsyncpa [#allocation4 + $0x1], 1 }

</bundles_post_ra>
